<compile_context>
chip_gen: v7x
topology: tpu7x:2x2x1
jax: 0.10.0
libtpu: 0.0.40
codegen_flags: <defaults>
</compile_context>

<pallas_src>
import functools

import jax
import jax.numpy as jnp
from jax.experimental import pallas as pl
from jax.experimental.pallas import tpu as pltpu

HIDDEN = 32
LANE = 128          # fused intermediate width (policy 32 | value 32 | zero pad)
BIAS_ROWS = 8       # bias rows folded at the bottom of the weight slab


def _round_up(x, m):
    return ((x + m - 1) // m) * m


def _cdiv(a, b):
    return -(-a // b)


# ----------------------------------------------------------------------------
# Kernel: 3 fused bf16 MXU dots (f32 accumulation), narrow f32 output store.
# ----------------------------------------------------------------------------
def a2c_fused_kernel(s_ref, w_ref, out_ref, *, s_dim, sp, out_w):
    # Activations arrive f32 from HBM; cast to bf16 in-VMEM (VPU work hidden
    # under DMA) instead of an extra XLA cast pass over HBM.
    s = s_ref[...].astype(jnp.bfloat16)                          # [TB, s_dim]

    w1 = w_ref[0:s_dim, :]                                       # [s_dim,128] (Wp1|Wv1|0)
    w2 = w_ref[sp:sp + LANE, :]                                  # [128,128] blkdiag(Wp2,Wv2)
    w3 = w_ref[sp + LANE:sp + 2 * LANE, :]                       # [128,128] blkdiag(Wpfc,Wvfc)
    b = w_ref[sp + 2 * LANE:sp + 2 * LANE + BIAS_ROWS, :].astype(jnp.float32)

    h = jnp.dot(s, w1, preferred_element_type=jnp.float32) + b[0:1, :]
    h = jnp.maximum(h, 0.0).astype(jnp.bfloat16)
    h = jnp.dot(h, w2, preferred_element_type=jnp.float32) + b[1:2, :]
    h = jnp.maximum(h, 0.0).astype(jnp.bfloat16)
    out = jnp.dot(h, w3, preferred_element_type=jnp.float32) + b[2:3, :]

    # Narrow store: only the first out_w (= a_dim+1 rounded to 8) lanes are
    # useful -> ~16x fewer HBM writeback bytes than a 128-lane f32 slab.
    out_ref[...] = out[:, :out_w].astype(out_ref.dtype)


# ----------------------------------------------------------------------------
# One-time parameter packing (outside the kernel): one bf16 slab, weights+bias.
# ----------------------------------------------------------------------------
def pack_params(params, s_dim, a_dim):
    """Fuse/pad all Linear params into ONE bf16 slab [W1; W2; W3; biases]."""
    assert a_dim + 1 <= LANE, "a_dim + 1 must fit within the 128-lane fused width"
    sp = _round_up(s_dim, 8)   # keeps W2/W3/bias row offsets sublane-aligned

    # Layer 1: [sp, 128]; cols 0:32 policy branch, 32:64 value branch.
    w1 = jnp.zeros((sp, LANE), jnp.float32)
    w1 = w1.at[:s_dim, 0:HIDDEN].set(params["wp1"])
    w1 = w1.at[:s_dim, HIDDEN:2 * HIDDEN].set(params["wv1"])

    # Layer 2: block-diagonal in the top-left [64, 64] of a [128, 128] slab.
    w2 = jnp.zeros((LANE, LANE), jnp.float32)
    w2 = w2.at[0:HIDDEN, 0:HIDDEN].set(params["wp2"])
    w2 = w2.at[HIDDEN:2 * HIDDEN, HIDDEN:2 * HIDDEN].set(params["wv2"])

    # Layer 3: policy head -> cols 0:a_dim, value head -> col a_dim.
    w3 = jnp.zeros((LANE, LANE), jnp.float32)
    w3 = w3.at[0:HIDDEN, 0:a_dim].set(params["wpfc"])
    w3 = w3.at[HIDDEN:2 * HIDDEN, a_dim:a_dim + 1].set(params["wvfc"])

    # Biases folded into the same slab (rows sp+256 .. sp+263).
    b = jnp.zeros((BIAS_ROWS, LANE), jnp.float32)
    b = b.at[0, 0:HIDDEN].set(params["bp1"][0])
    b = b.at[0, HIDDEN:2 * HIDDEN].set(params["bv1"][0])
    b = b.at[1, 0:HIDDEN].set(params["bp2"][0])
    b = b.at[1, HIDDEN:2 * HIDDEN].set(params["bv2"][0])
    b = b.at[2, 0:a_dim].set(params["bpfc"][0])
    b = b.at[2, a_dim:a_dim + 1].set(params["bvfc"][0])

    # bf16: native full-rate MXU everywhere, half the weight DMA. Zero padding
    # stays exactly zero in bf16, so the block-diagonal fusion semantics hold.
    w_slab = jnp.concatenate([w1, w2, w3, b], axis=0).astype(jnp.bfloat16)
    return w_slab, sp


# ----------------------------------------------------------------------------
# Wrapper
# ----------------------------------------------------------------------------
def _choose_row_tile(B):
    # Big tiles amortize the ~0.35us/step overhead on single-TC v5e/v6e; for
    # B >= 512, use an even number of balanced tiles so ("parallel",) can
    # shard the batch across v7x's two TensorCores. No batch padding: the grid
    # is a cdiv and Pallas clips the ragged boundary block.
    TB_CAP = 1024
    n_tiles = max(1, _cdiv(B, TB_CAP))
    if B >= 512:
        n_tiles = max(n_tiles, 2)
        if n_tiles % 2:
            n_tiles += 1
    return _round_up(_cdiv(B, n_tiles), 8)


def a2c_forward(s, w_slab, *, s_dim, a_dim, sp):
    """Forward pass. s: [B, s_dim] f32. Returns (policies [B,a_dim], values [B,1])."""
    B = s.shape[0]
    out_w = _round_up(a_dim + 1, 8)

    TB = _choose_row_tile(B)
    grid = (pl.cdiv(B, TB),)

    kernel = functools.partial(a2c_fused_kernel, s_dim=s_dim, sp=sp, out_w=out_w)

    flops = 2 * B * (s_dim * LANE + LANE * LANE + LANE * LANE)
    bytes_accessed = 4 * s.size + 2 * w_slab.size + 4 * B * out_w
    cost = pl.CostEstimate(flops=flops, transcendentals=0,
                           bytes_accessed=bytes_accessed)

    out = pl.pallas_call(
        kernel,
        out_shape=jax.ShapeDtypeStruct((B, out_w), jnp.float32),
        grid=grid,
        in_specs=[
            pl.BlockSpec((TB, s_dim), lambda i: (i, 0)),     # activations: row-tiled
            pl.BlockSpec(w_slab.shape, lambda i: (0, 0)),    # fused weights+biases: resident
        ],
        out_specs=pl.BlockSpec((TB, out_w), lambda i: (i, 0)),
        compiler_params=pltpu.CompilerParams(
            dimension_semantics=("parallel",),               # v7x: shard batch over 2 TCs
        ),
        cost_estimate=cost,
    )(s, w_slab)

    # Two tiny output slices (unavoidable for the (policies, values) API).
    policies = out[:, :a_dim]
    values = out[:, a_dim:a_dim + 1]
    return policies, values


# ----------------------------------------------------------------------------
# Params init (PyTorch nn.Linear-style) and pure-JAX f32 reference.
# ----------------------------------------------------------------------------
def init_params(key, s_dim, a_dim):
    keys = jax.random.split(key, 12)

    def lin(kw, kb, fan_in, fan_out):
        bound = 1.0 / jnp.sqrt(fan_in)
        w = jax.random.uniform(kw, (fan_in, fan_out), jnp.float32, -bound, bound)
        b = jax.random.uniform(kb, (1, fan_out), jnp.float32, -bound, bound)
        return w, b

    wp1, bp1 = lin(keys[0], keys[1], s_dim, HIDDEN)
    wp2, bp2 = lin(keys[2], keys[3], HIDDEN, HIDDEN)
    wpfc, bpfc = lin(keys[4], keys[5], HIDDEN, a_dim)
    wv1, bv1 = lin(keys[6], keys[7], s_dim, HIDDEN)
    wv2, bv2 = lin(keys[8], keys[9], HIDDEN, HIDDEN)
    wvfc, bvfc = lin(keys[10], keys[11], HIDDEN, 1)

    return dict(
        wp1=wp1, bp1=bp1, wp2=wp2, bp2=bp2, wpfc=wpfc, bpfc=bpfc,
        wv1=wv1, bv1=bv1, wv2=wv2, bv2=bv2, wvfc=wvfc, bvfc=bvfc,
    )


def a2c_forward_ref(s, p):
    h = jax.nn.relu(s @ p["wp1"] + p["bp1"])
    h = jax.nn.relu(h @ p["wp2"] + p["bp2"])
    policies = h @ p["wpfc"] + p["bpfc"]
    g = jax.nn.relu(s @ p["wv1"] + p["bv1"])
    g = jax.nn.relu(g @ p["wv2"] + p["bv2"])
    values = g @ p["wvfc"] + p["bvfc"]
    return policies, values


if __name__ == "__main__":
    key = jax.random.PRNGKey(0)
    k_param, k_input = jax.random.split(key)

    B, S_DIM, A_DIM = 8, 16, 4
    params = init_params(k_param, S_DIM, A_DIM)
    s = jax.random.normal(k_input, (B, S_DIM), jnp.float32)

    # Pack/fuse the weights+biases once outside the kernel (bf16 slab).
    w_slab, sp = pack_params(params, S_DIM, A_DIM)

    policies, values = a2c_forward(s, w_slab, s_dim=S_DIM, a_dim=A_DIM, sp=sp)
    jax.block_until_ready((policies, values))

    ref_p, ref_v = a2c_forward_ref(s, params)
    assert policies.shape == (B, A_DIM) and values.shape == (B, 1)
    # bf16 MXU operands (f32 accumulation) -> loosened tolerance vs f32 reference.
    assert jnp.allclose(policies, ref_p, atol=5e-2, rtol=5e-2)
    assert jnp.allclose(values, ref_v, atol=5e-2, rtol=5e-2)

    print("KERNEL_OK")
</pallas_src>

<mosaic_0001>
module attributes {stable_mosaic.version = 11 : i64} {
  func.func @a2c_fused_kernel(%arg0: i32, %arg1: memref<8x16xf32, #tpu.memory_space<vmem>>, %arg2: memref<280x128xbf16, #tpu.memory_space<vmem>>, %arg3: memref<8x8xf32, #tpu.memory_space<vmem>>) attributes {dimension_semantics = [#tpu.dimension_semantics<parallel>], iteration_bounds = array<i64: 1>, scalar_prefetch = 0 : i64, scratch_operands = 0 : i64, tpu.core_type = #tpu.core_type<tc>, window_params = [{transform_indices = @transform_0, window_bounds = array<i64: 8, 16>}, {pipeline_mode = #tpu.pipeline_mode<synchronous>, transform_indices = @transform_1, window_bounds = array<i64: 280, 128>}, {transform_indices = @transform_2, window_bounds = array<i64: 8, 8>}]} {
    %c0 = arith.constant 0 : index
    %c0_0 = arith.constant 0 : index
    %0 = vector.load %arg1[%c0, %c0_0] : memref<8x16xf32, #tpu.memory_space<vmem>>, vector<8x16xf32>
    %1 = arith.truncf %0 : vector<8x16xf32> to vector<8x16xbf16>
    %c0_1 = arith.constant 0 : index
    %c0_2 = arith.constant 0 : index
    %2 = vector.load %arg2[%c0_1, %c0_2] : memref<280x128xbf16, #tpu.memory_space<vmem>>, vector<16x128xbf16>
    %c16 = arith.constant 16 : index
    %c0_3 = arith.constant 0 : index
    %3 = vector.load %arg2[%c16, %c0_3] : memref<280x128xbf16, #tpu.memory_space<vmem>>, vector<128x128xbf16>
    %c144 = arith.constant 144 : index
    %c0_4 = arith.constant 0 : index
    %4 = vector.load %arg2[%c144, %c0_4] : memref<280x128xbf16, #tpu.memory_space<vmem>>, vector<128x128xbf16>
    %c272 = arith.constant 272 : index
    %c0_5 = arith.constant 0 : index
    %5 = vector.load %arg2[%c272, %c0_5] : memref<280x128xbf16, #tpu.memory_space<vmem>>, vector<8x128xbf16>
    %6 = arith.extf %5 : vector<8x128xbf16> to vector<8x128xf32>
    %cst = arith.constant dense<0.000000e+00> : vector<8x128xf32>
    %7 = tpu.matmul %1, %2, %cst {dimension_numbers = #tpu.dot_dimension_numbers<[1], [0], [0], [1], [0, 0, 1, 1], [], []>} : vector<8x16xbf16>, vector<16x128xbf16>, vector<8x128xf32> -> vector<8x128xf32>
    %8 = vector.extract_strided_slice %6 {offsets = [0, 0], sizes = [1, 128], strides = [1, 1]} : vector<8x128xf32> to vector<1x128xf32>
    %9 = vector.broadcast %8 : vector<1x128xf32> to vector<8x128xf32>
    %10 = arith.addf %7, %9 : vector<8x128xf32>
    %cst_6 = arith.constant 0.000000e+00 : f32
    %11 = vector.broadcast %cst_6 : f32 to vector<8x128xf32>
    %12 = arith.maximumf %10, %11 : vector<8x128xf32>
    %13 = arith.truncf %12 : vector<8x128xf32> to vector<8x128xbf16>
    %cst_7 = arith.constant dense<0.000000e+00> : vector<8x128xf32>
    %14 = tpu.matmul %13, %3, %cst_7 {dimension_numbers = #tpu.dot_dimension_numbers<[1], [0], [0], [1], [0, 0, 1, 1], [], []>} : vector<8x128xbf16>, vector<128x128xbf16>, vector<8x128xf32> -> vector<8x128xf32>
    %15 = vector.extract_strided_slice %6 {offsets = [1, 0], sizes = [1, 128], strides = [1, 1]} : vector<8x128xf32> to vector<1x128xf32>
    %16 = vector.broadcast %15 : vector<1x128xf32> to vector<8x128xf32>
    %17 = arith.addf %14, %16 : vector<8x128xf32>
    %cst_8 = arith.constant 0.000000e+00 : f32
    %18 = vector.broadcast %cst_8 : f32 to vector<8x128xf32>
    %19 = arith.maximumf %17, %18 : vector<8x128xf32>
    %20 = arith.truncf %19 : vector<8x128xf32> to vector<8x128xbf16>
    %cst_9 = arith.constant dense<0.000000e+00> : vector<8x128xf32>
    %21 = tpu.matmul %20, %4, %cst_9 {dimension_numbers = #tpu.dot_dimension_numbers<[1], [0], [0], [1], [0, 0, 1, 1], [], []>} : vector<8x128xbf16>, vector<128x128xbf16>, vector<8x128xf32> -> vector<8x128xf32>
    %22 = vector.extract_strided_slice %6 {offsets = [2, 0], sizes = [1, 128], strides = [1, 1]} : vector<8x128xf32> to vector<1x128xf32>
    %23 = vector.broadcast %22 : vector<1x128xf32> to vector<8x128xf32>
    %24 = arith.addf %21, %23 : vector<8x128xf32>
    %25 = vector.extract_strided_slice %24 {offsets = [0, 0], sizes = [8, 8], strides = [1, 1]} : vector<8x128xf32> to vector<8x8xf32>
    %c0_10 = arith.constant 0 : index
    %c0_11 = arith.constant 0 : index
    %26 = vector.load %arg3[%c0_10, %c0_11] : memref<8x8xf32, #tpu.memory_space<vmem>>, vector<8x8xf32>
    tpu.vector_store %arg3[%c0_10, %c0_11], %25 {strides = array<i32>} : memref<8x8xf32, #tpu.memory_space<vmem>>, vector<8x8xf32>,
    return
  }
  func.func @transform_0(%arg0: i32) -> (i32, i32) {
    %c0_i32 = arith.constant 0 : i32
    %c0_i32_0 = arith.constant 0 : i32
    return %arg0, %c0_i32 : i32, i32
  }
  func.func @transform_1(%arg0: i32) -> (i32, i32) {
    %c0_i32 = arith.constant 0 : i32
    %c0_i32_0 = arith.constant 0 : i32
    %c0_i32_1 = arith.constant 0 : i32
    return %c0_i32, %c0_i32_0 : i32, i32
  }
  func.func @transform_2(%arg0: i32) -> (i32, i32) {
    %c0_i32 = arith.constant 0 : i32
    %c0_i32_0 = arith.constant 0 : i32
    return %arg0, %c0_i32 : i32, i32
  }
}

</mosaic_0001>

<bundles_post_ra>
// kernel: tpu_custom_call.1
= control target key start
LH: loop header
LB: loop body
LE: loop exit
PB: predicated region body
PF: predicated region fallthrough
CT: control target
= control target key end

     0   :  { %7 = vsyncpa [#allocation3], 0  ;;  %s602_s0 = inlined_call_operand.hbm [shape: f32[8,16], index: 0, kind: input, shape index: {}]   ;;  %s603_s1 = inlined_call_operand.hbm [shape: bf16[280,128], index: 1, kind: input, shape index: {}]   ;;  %s604_s2 = inlined_call_operand.hbm [shape: f32[8,8], index: 2, kind: output, shape index: {}]  }
   0x1   :  { %8 = vsyncpa [#allocation6], 0 }
   0x2   :  { %9 = vsyncpa [#allocation4], 0  ;;  %s517_s9 = smov [#allocation2]   ;;  %s518_s11 = smov [#allocation5]  }
   0x3   :  { %s16_s10 = sshll.u32 %s517_s9, 4  ;;  %s25_s12 = sshll.u32 %s518_s11, 4  ;;  %s17_s10 = int_to_ptr.vmem [resolvable:$true] %s16_s10  ;;  %s539_s12 = int_to_ptr.vmem [resolvable:$true] %s25_s12 }
   0x4   :  { %s445_s15 = scalar_lea.hbm %s602_s0, 128 }
   0x5   :  { %p446_p0 = scmp.ne.s32.totalorder %s602_s0, %s445_s15  ;;  %p449_p1 = scmp.lt.u32.totalorder %s445_s15, %s602_s0 }
   0x7   :  { %p451_p2 = pnand %p449_p1, %p446_p0 }
   0x9   :  { %454 = shalt.err (!%p451_p2)
}
   0xa   :  { %s455_s20 = scalar_lea.vmem %s17_s10, 128  ;;  %p460_p4 = scmp.lt.s32.totalorder %s17_s10, %s17_s10 }
   0xb   :  { %p456_p3 = scmp.ne.s32.totalorder %s17_s10, %s455_s20  ;;  %p461_p5 = scmp.lt.s32.totalorder %s455_s20, %s455_s20 }
   0xd   :  { %p462_p6 = por %p461_p5, %p460_p4 }
   0xf   :  { %p463_p7 = pnand %p462_p6, %p456_p3 }
  0x11   :  { %466 = shalt.err (!%p463_p7)
}
  0x12   :  { %19 = dma.hbm_to_vmem [thread:$0]  %s602_s0, 128, %s17_s10, [#allocation3]  }
  0x13   :  { %s467_s25 = scalar_lea.hbm %s603_s1, 2240 }
  0x14   :  { %p468_p8 = scmp.ne.s32.totalorder %s603_s1, %s467_s25  ;;  %p471_p9 = scmp.lt.u32.totalorder %s467_s25, %s603_s1 }
  0x16   :  { %p473_p10 = pnand %p471_p9, %p468_p8 }
  0x18   :  { %476 = shalt.err (!%p473_p10)
}
  0x19   :  { %s477_s30 = scalar_lea.vmem %s539_s12, 2240  ;;  %p482_p12 = scmp.lt.s32.totalorder %s539_s12, %s539_s12 }
  0x1a   :  { %p478_p11 = scmp.ne.s32.totalorder %s539_s12, %s477_s30  ;;  %p483_p13 = scmp.lt.s32.totalorder %s477_s30, %s477_s30 }
  0x1c   :  { %p484_p0 = por %p483_p13, %p482_p12 }
  0x1e   :  { %p485_p1 = pnand %p484_p0, %p478_p11 }
  0x20   :  { %488 = shalt.err (!%p485_p1)
}
  0x21   :  { %s519_s0 = smov 64   ;;  %s520_s3 = smov 4  }
  0x22   :  { %31 = dma.hbm_to_vmem [thread:$0]  %s603_s1, 2240, %s539_s12, [#allocation6], %s519_s0, %s519_s0, %s520_s3  }
  0x23   :  { %511 = dma.done.wait [#allocation3], 128  }
  0x24   :  { %512 = vsyncadd [#allocation3], 4294967168 }
  0x25   :  { %513 = dma.done.wait [#allocation6], 2240  }
  0x26   :  { %514 = vsyncadd [#allocation6], 4294965056  ;;  %v521_v0 = vmov 0.0   ;;  %vm522_vm0 = vmmov 0   ;;  %v428_v1 = vld [vmem:[#allocation5] sm:$0xff]   ;;  %v39_v2 = vld [vmem:[#allocation2] sm:$0xff]  ;;  %v77_v18 = vlaneseq }
  0x27   :  { %375 = vmatprep.subr.bf16.mxu0 %v521_v0  ;;  %377 = vmatprep.mubr.msk.bf16.mxu0 %vm522_vm0, %v521_v0  ;;  %v40_v3 = vpack.c.bf16 %v39_v2, %v39_v2  ;;  %vm87_vm1 = vcmask 130048   ;;  %v429_v4 = vld [vmem:[#allocation5 + $0x8] sm:$0xff]   ;;  %v430_v5 = vld [vmem:[#allocation5 + $0x10] sm:$0xff]   ;;  %v431_v6 = vld [vmem:[#allocation5 + $0x18] sm:$0xff]   ;;  %s523_s1 = smov [#allocation7]   ;;  %vm319_vm2 = vcmask 64512  }
  0x28   :  { %381 = vmatprep.subr.bf16.mxu1 %v521_v0  ;;  %397 = vmatprep.mubr.msk.bf16.mxu1 %vm522_vm0, %v521_v0  ;;  %v432_v7 = vld [vmem:[#allocation5 + $0x20] sm:$0xff]   ;;  %v433_v8 = vld [vmem:[#allocation5 + $0x28] sm:$0xff]   ;;  %v434_v9 = vld [vmem:[#allocation5 + $0x30] sm:$0xff]   ;;  %v78_v19 = vshrl.u32 %v77_v18, 7  ;;  %s327_s6 = sshll.u32 %s523_s1, 4  ;;  %s328_s6 = int_to_ptr.vmem [resolvable:$true] %s327_s6 }
  0x29   :  { %376 = vmatpush3.bf16.msra.mxu0 %v428_v1  ;;  %382 = vmatpush3.bf16.msra.mxu1 %v429_v4  ;;  %v435_v10 = vld [vmem:[#allocation5 + $0x38] sm:$0xff]   ;;  %v436_v11 = vld [vmem:[#allocation5 + $0x40] sm:$0xff]   ;;  %v437_v12 = vld [vmem:[#allocation5 + $0x48] sm:$0xff]   ;;  %s489_s7 = scalar_lea.vmem %s328_s6, 128  ;;  %p494_p3 = scmp.lt.s32.totalorder %s328_s6, %s328_s6 }
  0x2a   :  { %401 = vmatprep.subr.bf16.mxu0 %v521_v0  ;;  %383 = vmatprep.subr.bf16.mxu1 %v521_v0  ;;  %v438_v13 = vld [vmem:[#allocation5 + $0x50] sm:$0xff]   ;;  %v439_v14 = vld [vmem:[#allocation5 + $0x58] sm:$0xff]   ;;  %v440_v15 = vld [vmem:[#allocation5 + $0x60] sm:$0xff]   ;;  %v79_v22 = vsub.s32 0, %v78_v19  ;;  %v135_v33 = vsub.s32 1, %v78_v19  ;;  %v229_v42 = vsub.s32 2, %v78_v19  ;;  %p490_p2 = scmp.ne.s32.totalorder %s328_s6, %s489_s7  ;;  %p495_p4 = scmp.lt.s32.totalorder %s489_s7, %s489_s7 }
  0x2b   :  { %v441_v16 = vld [vmem:[#allocation5 + $0x68] sm:$0xff]   ;;  %v442_v17 = vld [vmem:[#allocation5 + $0x70] sm:$0xff]   ;;  %v443_v31 = vld [vmem:[#allocation5 + $0x78] sm:$0xff]  }
  0x2c   :  { %378 = vmatmul.mubr.msk.bf16.vlgmr.msra.gmra.mrb[0].mxu0 %vm87_vm1, %v40_v3  ;;  %v75_v20 = vld [vmem:[#allocation5 + $0x88] sm:$0xf]  ;;  %v444_v32 = vld [vmem:[#allocation5 + $0x80] sm:$0xff]   ;;  %p496_p5 = por %p495_p4, %p494_p3 }
  0x2d   :  { %417 = vmatprep.mubr.msk.bf16.mxu0 %vm522_vm0, %v521_v0  ;;  %384 = vmatpush3.bf16.msra.mxu1 %v430_v5  ;;  %v76_v21 = vunpack.c.l.bf16 %v75_v20 }
  0x2e   :  { %385 = vmatprep.subr.bf16.mxu1 %v521_v0  ;;  %402 = vmatpush3.bf16.msra.mxu0 %v437_v12  ;;  %p497_p6 = pnand %p496_p5, %p490_p2 }
  0x2f   :  { %403 = vmatprep.subr.bf16.mxu0 %v521_v0  ;;  %v80_v23 = vrot.slane %v76_v21, %v79_v22  ;;  %v136_v34 = vrot.slane %v76_v21, %v135_v33  ;;  %v230_v43 = vrot.slane %v76_v21, %v229_v42 }
  0x31   :  { %386 = vmatpush3.bf16.msra.mxu1 %v431_v6 }
  0x32   :  { %387 = vmatprep.subr.bf16.mxu1 %v521_v0  ;;  %404 = vmatpush3.bf16.msra.mxu0 %v438_v13 }
  0x33   :  { %405 = vmatprep.subr.bf16.mxu0 %v521_v0 }
  0x35   :  { %388 = vmatpush3.bf16.msra.mxu1 %v432_v7 }
  0x36   :  { %389 = vmatprep.subr.bf16.mxu1 %v521_v0  ;;  %406 = vmatpush3.bf16.msra.mxu0 %v439_v14 }
  0x37   :  { %407 = vmatprep.subr.bf16.mxu0 %v521_v0 }
  0x39   :  { %390 = vmatpush3.bf16.msra.mxu1 %v433_v8 }
  0x3a   :  { %391 = vmatprep.subr.bf16.mxu1 %v521_v0  ;;  %408 = vmatpush3.bf16.msra.mxu0 %v440_v15 }
  0x3b   :  { %409 = vmatprep.subr.bf16.mxu0 %v521_v0 }
  0x3d   :  { %392 = vmatpush3.bf16.msra.mxu1 %v434_v9 }
  0x3e   :  { %393 = vmatprep.subr.bf16.mxu1 %v521_v0  ;;  %410 = vmatpush3.bf16.msra.mxu0 %v441_v16 }
  0x3f   :  { %411 = vmatprep.subr.bf16.mxu0 %v521_v0 }
  0x41   :  { %394 = vmatpush3.bf16.msra.mxu1 %v435_v10 }
  0x42   :  { %395 = vmatprep.subr.bf16.mxu1 %v521_v0  ;;  %412 = vmatpush3.bf16.msra.mxu0 %v442_v17 }
  0x43   :  { %413 = vmatprep.subr.bf16.mxu0 %v521_v0 }
  0x45   :  { %396 = vmatpush3.bf16.msra.mxu1 %v436_v11 }
  0x46   :  { %414 = vmatpush3.bf16.msra.mxu0 %v443_v31 }
  0x47   :  { %415 = vmatprep.subr.bf16.mxu0 %v521_v0 }
  0x4a   :  { %416 = vmatpush3.bf16.msra.mxu0 %v444_v32 }
  0xff   :  { %v125_v24 = vpop.f32.mrb[0].mxu0 }
 0x100   :  { %v126_v25 = vadd.f32 %v125_v24, %v80_v23  ;;  %v379_v26 = vpop.f32.mrb[1].mxu0 }
 0x101   :  { %v128_v27 = vpop.f32.mrb[2].mxu0 }
 0x102   :  { %v131_v28 = vmax.f32 %v126_v25, 0.0  ;;  %v380_v29 = vpop.f32.mrb[3].mxu0 }
 0x104   :  { %v132_v30 = vpack.c.bf16 %v131_v28, %v131_v28 }
 0x106   :  { %398 = vmatmul.mubr.bf16.vlgmr.msra.gmra.mrb[0].mxu1 %v132_v30 }
 0x1d9   :  { %v219_v35 = vpop.f32.mrb[0].mxu1 }
 0x1da   :  { %v220_v36 = vadd.f32 %v219_v35, %v136_v34  ;;  %v399_v37 = vpop.f32.mrb[1].mxu1 }
 0x1db   :  { %v222_v38 = vpop.f32.mrb[2].mxu1 }
 0x1dc   :  { %v225_v39 = vmax.f32 %v220_v36, 0.0  ;;  %v400_v40 = vpop.f32.mrb[3].mxu1 }
 0x1de   :  { %v226_v41 = vpack.c.bf16 %v225_v39, %v225_v39 }
 0x1e0   :  { %418 = vmatmul.mubr.bf16.vlgmr.msra.gmra.mrb[4].mxu0 %v226_v41 }
 0x2b3   :  { %v313_v44 = vpop.f32.mrb[4].mxu0 }
 0x2b4   :  { %v314_v45 = vadd.f32 %v313_v44, %v230_v43  ;;  %v419_v46 = vpop.f32.mrb[5].mxu0 }
 0x2b5   :  { %v316_v47 = vpop.f32.mrb[6].mxu0 }
 0x2b6   :  { %v420_v48 = vpop.f32.mrb[7].mxu0  ;;  %320 = vst.msk [vmem:[#allocation7] sm:$0xff] %vm319_vm2, %v314_v45 }
 0x2b7   :  { %500 = shalt.err (!%p497_p6)
}
 0x2b8   :  { %s501_s10 = scalar_lea.hbm %s604_s2, 128 }
 0x2b9   :  { %p502_p7 = scmp.ne.s32.totalorder %s604_s2, %s501_s10  ;;  %p505_p8 = scmp.lt.u32.totalorder %s501_s10, %s604_s2 }
 0x2bb   :  { %p507_p9 = pnand %p505_p8, %p502_p7 }
 0x2bd   :  { %510 = shalt.err (!%p507_p9)
}
 0x2be   :  { %330 = dma.vmem_to_hbm [thread:$0]  %s328_s6, 128, %s604_s2, [#allocation4]  }
 0x2bf   :  { %515 = dma.done.wait [#allocation4], 128  }
 0x2c0   :  { %516 = vsyncadd [#allocation4], 4294967168 }
 0x2c1   :  { %334 = vsyncpa [#allocation3], 1 }
 0x2c2   :  { %335 = vsyncpa [#allocation6], 1 }
 0x2c3   :  { %336 = vsyncpa [#allocation4], 1 }

</bundles_post_ra>
